<compile_context>
chip_gen: v6e
topology: v6e:2x2x1
jax: 0.10.0
libtpu: 0.0.40
codegen_flags: <defaults>
</compile_context>

<pallas_src>
import functools
import math

import jax
import jax.numpy as jnp
from jax.experimental import pallas as pl
from jax.experimental.pallas import tpu as pltpu


# ----------------------------------------------------------------------------
# Kernels
# ----------------------------------------------------------------------------
def _ntk_kernel_multi_k(*refs, scale, beta, has_bias):
    # refs = (x_ref, wt_ref[, b_ref], o_ref, acc_ref); wt is (tk, tn) — NN GEMM.
    if has_bias:
        x_ref, wt_ref, b_ref, o_ref, acc_ref = refs
    else:
        x_ref, wt_ref, o_ref, acc_ref = refs
        b_ref = None

    k = pl.program_id(2)
    partial = jnp.dot(x_ref[...], wt_ref[...], preferred_element_type=jnp.float32)

    @pl.when(k == 0)
    def _init():
        acc_ref[...] = partial          # first partial product: no zero-fill pass

    @pl.when(k > 0)
    def _accum():
        acc_ref[...] += partial

    @pl.when(k == pl.num_programs(2) - 1)
    def _finalize():
        out = acc_ref[...] * scale
        if has_bias:
            out = out + beta * b_ref[...].astype(jnp.float32)   # (1, tn) broadcast
        o_ref[...] = out.astype(o_ref.dtype)


def _ntk_kernel_single_k(*refs, scale, beta, has_bias):
    # Fast path: whole K in one tile — no scratch, no pl.when, direct store.
    if has_bias:
        x_ref, wt_ref, b_ref, o_ref = refs
    else:
        x_ref, wt_ref, o_ref = refs
        b_ref = None
    out = jnp.dot(x_ref[...], wt_ref[...], preferred_element_type=jnp.float32) * scale
    if has_bias:
        out = out + beta * b_ref[...].astype(jnp.float32)
    o_ref[...] = out.astype(o_ref.dtype)


# ----------------------------------------------------------------------------
# Tiling helpers
# ----------------------------------------------------------------------------
def _round_up(x, m):
    return ((x + m - 1) // m) * m


def _cdiv(a, b):
    return (a + b - 1) // b


def _choose_tile(dim, pref, align):
    """Legal, pad-aware tile for a dim: full-dim block when it fits one tile,
    otherwise the aligned tile <= pref that minimizes zero padding."""
    pref = max(align, (pref // align) * align)   # round user tile to alignment
    if dim <= pref:
        return dim                               # full-dim block: always legal, no pad
    best_t, best_pad = pref, (-dim) % pref
    t = pref - align
    while t >= align:
        pad = (-dim) % t
        if pad < best_pad:                       # strict: ties keep the larger tile
            best_t, best_pad = t, pad
        t -= align
    return best_t


def _pad2(a, rows, cols):
    if a.shape == (rows, cols):
        return a
    return jnp.pad(a, ((0, rows - a.shape[0]), (0, cols - a.shape[1])))


# ----------------------------------------------------------------------------
# Wrapper
# ----------------------------------------------------------------------------
def ntk_linear(x, weight, bias=None, *, beta=0.1, tm=256, tn=512, tk=512,
               compute_dtype=None):
    """x: (B, in_features), weight: (out_features, in_features), bias: (out_features,)|None."""
    B, K = x.shape
    N, K_w = weight.shape
    assert K == K_w, f"Wrong Input Features. Please use tensor with {K_w} Input Features"

    scale = 1.0 / math.sqrt(K)           # host-side, no trace-time round trip
    has_bias = bias is not None
    out_dtype = x.dtype                  # output follows original input dtype

    if compute_dtype is not None:
        x = x.astype(compute_dtype)
        weight = weight.astype(compute_dtype)

    # Pre-transpose the (static) weight to (K, N): the kernel then runs a plain
    # NN GEMM — no per-tile transpose competing for the vector-extended slots.
    wt = weight.T                        # (K, N); amortizes for repeated calls

    # ---- tile selection -----------------------------------------------------
    tm_e = _choose_tile(B, tm, 8)        # sublane-aligned
    tn_e = _choose_tile(N, tn, 128)      # lane-aligned (lane-dense output)
    tk_e = _choose_tile(K, tk, 128)

    # v7x megacore: guarantee >= 2 parallel output tiles when N splits cleanly.
    if _cdiv(B, tm_e) * _cdiv(N, tn_e) < 2 and N >= 256 and N % 256 == 0:
        tn_e = N // 2

    Bp = _round_up(B, tm_e)
    Np = _round_up(N, tn_e)
    Kp = _round_up(K, tk_e)

    # Only materialize padded copies when actually required (zero K-pad exact,
    # zero M/N rows/cols are sliced off after the kernel).
    xp = _pad2(x, Bp, Kp)
    wtp = _pad2(wt, Kp, Np)

    grid_k = Kp // tk_e
    single_k = grid_k == 1

    # ---- specs --------------------------------------------------------------
    inputs = [xp, wtp]
    if single_k:
        grid = (Bp // tm_e, Np // tn_e)
        in_specs = [
            pl.BlockSpec((tm_e, tk_e), lambda i, j: (i, 0)),     # x tile
            pl.BlockSpec((tk_e, tn_e), lambda i, j: (0, j)),     # weight.T tile
        ]
        out_specs = pl.BlockSpec((tm_e, tn_e), lambda i, j: (i, j))
        scratch_shapes = []
        dim_sem = ("parallel", "parallel")
        kernel_fn = _ntk_kernel_single_k
        if has_bias:
            in_specs.append(pl.BlockSpec((1, tn_e), lambda i, j: (0, j)))
    else:
        grid = (Bp // tm_e, Np // tn_e, grid_k)
        in_specs = [
            pl.BlockSpec((tm_e, tk_e), lambda i, j, k: (i, k)),  # x tile
            pl.BlockSpec((tk_e, tn_e), lambda i, j, k: (k, j)),  # weight.T tile
        ]
        out_specs = pl.BlockSpec((tm_e, tn_e), lambda i, j, k: (i, j))
        scratch_shapes = [pltpu.VMEM((tm_e, tn_e), jnp.float32)]
        dim_sem = ("parallel", "parallel", "arbitrary")
        kernel_fn = _ntk_kernel_multi_k
        if has_bias:
            in_specs.append(pl.BlockSpec((1, tn_e), lambda i, j, k: (0, j)))

    if has_bias:
        bp = _pad2(bias.reshape(1, N), 1, Np)
        inputs.append(bp)

    kernel = functools.partial(kernel_fn, scale=scale, beta=float(beta),
                               has_bias=has_bias)

    # ---- cost estimate & VMEM budget ---------------------------------------
    itemsize = jnp.dtype(xp.dtype).itemsize
    bytes_accessed = (
        B * K * itemsize + K * N * itemsize + B * N * jnp.dtype(out_dtype).itemsize
        + (N * jnp.dtype(bias.dtype).itemsize if has_bias else 0)
    )
    cost = pl.CostEstimate(flops=2 * B * N * K, transcendentals=0,
                           bytes_accessed=bytes_accessed)

    # double-buffered x, w, out (+ f32 acc).  Cap at 48 MiB: safe on v7x (64 MiB
    # physical) and raises the v5e/v6e scoped defaults when tiles are enlarged.
    resident = (2 * tm_e * tk_e + 2 * tk_e * tn_e + 2 * tm_e * tn_e) * itemsize
    if not single_k:
        resident += tm_e * tn_e * 4
    vmem_limit = min(max(2 * resident, 32 * 1024 * 1024), 48 * 1024 * 1024)

    out = pl.pallas_call(
        kernel,
        out_shape=jax.ShapeDtypeStruct((Bp, Np), out_dtype),
        grid_spec=pltpu.PrefetchScalarGridSpec(
            num_scalar_prefetch=0,
            grid=grid,
            in_specs=in_specs,
            out_specs=out_specs,
            scratch_shapes=scratch_shapes,
        ),
        compiler_params=pltpu.CompilerParams(
            dimension_semantics=dim_sem,
            vmem_limit_bytes=vmem_limit,
        ),
        cost_estimate=cost,
    )(*inputs)

    if (Bp, Np) != (B, N):
        out = out[:B, :N]
    return out


# ----------------------------------------------------------------------------
# Self-test
# ----------------------------------------------------------------------------
if __name__ == "__main__":
    # Deterministic synthetic params & input (normal init like reset_parameters()).
    B, in_features, out_features = 8, 32, 16
    beta = 0.1

    key = jax.random.PRNGKey(0)
    kx, kw, kb = jax.random.split(key, 3)
    x = jax.random.normal(kx, (B, in_features), dtype=jnp.float32)
    weight = jax.random.normal(kw, (out_features, in_features), dtype=jnp.float32)
    bias = jax.random.normal(kb, (out_features,), dtype=jnp.float32)

    scale = 1.0 / math.sqrt(in_features)

    # 1) With bias — single-K fast path, full-dim blocks, no padding.
    out = jax.block_until_ready(ntk_linear(x, weight, bias, beta=beta))
    ref = x @ (scale * weight.T) + beta * bias
    assert out.shape == (B, out_features)
    assert jnp.allclose(out, ref, atol=1e-5, rtol=1e-5), "mismatch vs reference (bias)"

    # 2) Without bias (bias-free kernel variant, no zeros DMA).
    out_nb = jax.block_until_ready(ntk_linear(x, weight, None, beta=beta))
    ref_nb = x @ (scale * weight.T)
    assert jnp.allclose(out_nb, ref_nb, atol=1e-5, rtol=1e-5), "mismatch vs reference (no bias)"

    # 3) Multi-tile / padded path: small tiles forced to exercise the M/N/K grid,
    #    first-product accumulator init, K zero-padding and output slicing.
    B2, K2, N2 = 24, 300, 200
    k2x, k2w, k2b = jax.random.split(jax.random.PRNGKey(1), 3)
    x2 = jax.random.normal(k2x, (B2, K2), dtype=jnp.float32)
    w2 = jax.random.normal(k2w, (N2, K2), dtype=jnp.float32)
    b2 = jax.random.normal(k2b, (N2,), dtype=jnp.float32)
    out2 = jax.block_until_ready(ntk_linear(x2, w2, b2, beta=beta, tm=8, tn=128, tk=128))
    ref2 = x2 @ ((1.0 / math.sqrt(K2)) * w2.T) + beta * b2
    assert out2.shape == (B2, N2)
    assert jnp.allclose(out2, ref2, atol=1e-4, rtol=1e-4), "mismatch vs reference (tiled)"

    # 4) bf16 compute path (MXU-native dtype, f32 accumulation, f32 output).
    out_bf = jax.block_until_ready(
        ntk_linear(x, weight, bias, beta=beta, compute_dtype=jnp.bfloat16))
    assert out_bf.dtype == jnp.float32
    assert jnp.allclose(out_bf, ref, atol=5e-2, rtol=5e-2), "mismatch vs reference (bf16)"

    print("KERNEL_OK")
</pallas_src>

<mosaic_0001>
module attributes {stable_mosaic.version = 11 : i64} {
  func.func @_ntk_kernel_single_k(%arg0: i32, %arg1: i32, %arg2: memref<8x32xf32, #tpu.memory_space<vmem>>, %arg3: memref<32x16xf32, #tpu.memory_space<vmem>>, %arg4: memref<1x16xf32, #tpu.memory_space<vmem>>, %arg5: memref<8x16xf32, #tpu.memory_space<vmem>>) attributes {dimension_semantics = [#tpu.dimension_semantics<parallel>, #tpu.dimension_semantics<parallel>], iteration_bounds = array<i64: 1, 1>, scalar_prefetch = 0 : i64, scratch_operands = 0 : i64, tpu.core_type = #tpu.core_type<tc>, window_params = [{transform_indices = @transform_0, window_bounds = array<i64: 8, 32>}, {transform_indices = @transform_1, window_bounds = array<i64: 32, 16>}, {transform_indices = @transform_2, window_bounds = array<i64: 1, 16>}, {transform_indices = @transform_3, window_bounds = array<i64: 8, 16>}]} {
    %c0 = arith.constant 0 : index
    %c0_0 = arith.constant 0 : index
    %0 = vector.load %arg2[%c0, %c0_0] : memref<8x32xf32, #tpu.memory_space<vmem>>, vector<8x32xf32>
    %c0_1 = arith.constant 0 : index
    %c0_2 = arith.constant 0 : index
    %1 = vector.load %arg3[%c0_1, %c0_2] : memref<32x16xf32, #tpu.memory_space<vmem>>, vector<32x16xf32>
    %cst = arith.constant dense<0.000000e+00> : vector<8x16xf32>
    %2 = tpu.matmul %0, %1, %cst {dimension_numbers = #tpu.dot_dimension_numbers<[1], [0], [0], [1], [0, 0, 1, 1], [], []>} : vector<8x32xf32>, vector<32x16xf32>, vector<8x16xf32> -> vector<8x16xf32>
    %cst_3 = arith.constant 0.176776692 : f32
    %3 = vector.broadcast %cst_3 : f32 to vector<8x16xf32>
    %4 = arith.mulf %2, %3 : vector<8x16xf32>
    %c0_4 = arith.constant 0 : index
    %c0_5 = arith.constant 0 : index
    %5 = vector.load %arg4[%c0_4, %c0_5] : memref<1x16xf32, #tpu.memory_space<vmem>>, vector<1x16xf32>
    %cst_6 = arith.constant 1.000000e-01 : f32
    %6 = vector.broadcast %cst_6 : f32 to vector<1x16xf32>
    %7 = arith.mulf %6, %5 : vector<1x16xf32>
    %8 = vector.broadcast %7 : vector<1x16xf32> to vector<8x16xf32>
    %9 = arith.addf %4, %8 : vector<8x16xf32>
    %c0_7 = arith.constant 0 : index
    %c0_8 = arith.constant 0 : index
    %10 = vector.load %arg5[%c0_7, %c0_8] : memref<8x16xf32, #tpu.memory_space<vmem>>, vector<8x16xf32>
    tpu.vector_store %arg5[%c0_7, %c0_8], %9 {strides = array<i32>} : memref<8x16xf32, #tpu.memory_space<vmem>>, vector<8x16xf32>,
    return
  }
  func.func @transform_0(%arg0: i32, %arg1: i32) -> (i32, i32) {
    %c0_i32 = arith.constant 0 : i32
    %c0_i32_0 = arith.constant 0 : i32
    return %arg0, %c0_i32 : i32, i32
  }
  func.func @transform_1(%arg0: i32, %arg1: i32) -> (i32, i32) {
    %c0_i32 = arith.constant 0 : i32
    %c0_i32_0 = arith.constant 0 : i32
    return %c0_i32, %arg1 : i32, i32
  }
  func.func @transform_2(%arg0: i32, %arg1: i32) -> (i32, i32) {
    %c0_i32 = arith.constant 0 : i32
    %c0_i32_0 = arith.constant 0 : i32
    return %c0_i32, %arg1 : i32, i32
  }
  func.func @transform_3(%arg0: i32, %arg1: i32) -> (i32, i32) {
    %c0_i32 = arith.constant 0 : i32
    return %arg0, %arg1 : i32, i32
  }
}

</mosaic_0001>

<bundles_post_ra>
// kernel: tpu_custom_call.1
= control target key start
LH: loop header
LB: loop body
LE: loop exit
PB: predicated region body
PF: predicated region fallthrough
CT: control target
= control target key end

     0   :  { %v162_v1 = vmov 0.0   ;;  %vm163_vm0 = vmmov 0   ;;  %s206_s0 = inlined_call_operand.vmem [shape: f32[8,32], index: 0, kind: input, shape index: {}]   ;;  %s207_s1 = inlined_call_operand.vmem [shape: f32[32,16], index: 1, kind: input, shape index: {}]   ;;  %s208_s2 = inlined_call_operand.vmem [shape: f32[1,16], index: 2, kind: input, shape index: {}]   ;;  %s209_s3 = inlined_call_operand.hbm [shape: f32[8,16], index: 3, kind: output, shape index: {}]  }
   0x1   :  { %v19_v0 = vld [vmem:[%s207_s1 + $0x18] sm:$0xff]  ;;  %126 = vmatprep.subr.mxu0 %v162_v1  ;;  %v18_v2 = vld [vmem:[%s207_s1 + $0x10] sm:$0xff]  ;;  %134 = vmatprep.mubr.msk.f32.mxu0 %vm163_vm0, %v162_v1 }
   0x2   :  { %8 = vsyncpa [#allocation3], 0  ;;  %127 = vmatpush3.msra.mxu0 %v19_v0  ;;  %v17_v3 = vld [vmem:[%s207_s1 + $0x8] sm:$0xff]  ;;  %v16_v4 = vld [vmem:[%s207_s1] sm:$0xff]  ;;  %vm20_vm1 = vcmask 261120   ;;  %v98_v6 = vlaneseq  ;;  %s164_s1 = smov [#allocation2]  }
   0x3   :  { %128 = vmatprep.subr.mxu0 %v162_v1  ;;  %v15_v5 = vld [vmem:[%s206_s0] sm:$0xff]  ;;  %s112_s24 = sshll.u32 %s164_s1, 4  ;;  %vm104_vm2 = vcmask 130048   ;;  %s113_s24 = int_to_ptr.vmem [resolvable:$true] %s112_s24 }
   0x4   :  { %129 = vmatpush3.msra.mxu0 %v18_v2  ;;  %v99_v7 = vshrl.u32 %v98_v6, 7  ;;  %v95_v8 = vld [vmem:[%s208_s2] sm:$0x1]  ;;  %s140_s0 = scalar_lea.vmem %s113_s24, 128  ;;  %p145_p1 = scmp.lt.s32.totalorder %s113_s24, %s113_s24 }
   0x5   :  { %130 = vmatprep.subr.mxu0 %v162_v1  ;;  %v96_v9 = vmul.f32 0.1, %v95_v8  ;;  %p141_p0 = scmp.ne.s32.totalorder %s113_s24, %s140_s0  ;;  %p146_p2 = scmp.lt.s32.totalorder %s140_s0, %s140_s0 }
   0x6   :  { %131 = vmatpush3.msra.mxu0 %v17_v3  ;;  %v100_v10 = vsub.s32 0, %v99_v7 }
   0x7   :  { %132 = vmatprep.subr.mxu0 %v162_v1  ;;  %p147_p3 = por %p146_p2, %p145_p1 }
   0x8   :  { %133 = vmatpush3.msra.mxu0 %v16_v4  ;;  %v101_v11 = vrot.slane %v96_v9, %v100_v10 }
   0x9   :  { %135 = vmatmul.mubr.msk.f32.vlgmr.msra.gmra.mxu0 %vm20_vm1, %v15_v5  ;;  %p148_p4 = pnand %p147_p3, %p141_p0 }
  0xc9   :  { %v90_v12 = vpop.f32.mrf.mxu0 }
  0xca   :  { %v94_v13 = vmul.f32 0.17677669, %v90_v12 }
  0xcb   :  { %v136_v14 = vpop.f32.mrf.mxu0 }
  0xcc   :  { %v103_v15 = vadd.f32 %v101_v11, %v94_v13 }
  0xce   :  { %105 = vst.msk [vmem:[#allocation2] sm:$0xff] %vm104_vm2, %v103_v15 }
  0xcf   :  { %151 = shalt.err (!%p148_p4)
}
  0xd0   :  { %115 = dma.vmem_to_hbm [thread:$0]  %s113_s24, 128, %s209_s3, [#allocation3]  }
  0xd1   :  { %160 = dma.done.wait [#allocation3], 128  }
  0xd2   :  { %161 = vsyncadd [#allocation3], 4294967168 }
  0xd3   :  { %119 = vsyncpa [#allocation3], 1 }

</bundles_post_ra>
